<compile_context>
chip_gen: v7x
topology: tpu7x:2x2x1
jax: 0.10.0
libtpu: 0.0.40
codegen_flags: <defaults>
</compile_context>

<pallas_src>
import jax
import jax.numpy as jnp
from jax.experimental import pallas as pl
from jax.experimental.pallas import tpu as pltpu


def _round_up(n, m):
    return ((n + m - 1) // m) * m


def _cross_attention_kernel(cond_ref, wv_ref, wo_ref, bo_ref, out_ref):
    # v = cond @ Wv. Softmax over the length-1 key axis is exactly 1, so
    # out == v; the whole q/k/sim/softmax path is dead compute and is omitted.
    v = jnp.dot(cond_ref[...], wv_ref[...], preferred_element_type=jnp.float32)
    # Feed the MXU its native (low-precision) input dtype; accumulate in f32.
    y = jnp.dot(v.astype(wo_ref.dtype), wo_ref[...],
                preferred_element_type=jnp.float32)
    # Bias add stays f32 on the VPU (v5e has no bf16 VPU path).
    out_ref[...] = (y + bo_ref[...]).astype(out_ref.dtype)
    # TODO(synk): nn.Dropout(p=0.0) is the identity; no kernel-side dropout.


def cross_attention(x, cond, wq, wk, wv, wo, bo, *, num_heads, dim_head,
                    compute_dtype=jnp.bfloat16, block_b=512):
    """y = CrossAttention(x, cond).  x / wq / wk are accepted for interface
    fidelity but do not influence the output (key length n == 1)."""
    del x, wq, wk  # mathematically dead for n == 1

    B, cond_dim = cond.shape
    inner_dim = num_heads * dim_head
    x_dim = wo.shape[1]

    lane = 128   # lane width
    sub = 16     # sublane multiple safe for both f32 (8) and bf16 (16)

    cdp = _round_up(cond_dim, lane)    # padded cond features
    idp = _round_up(inner_dim, lane)   # padded inner features
    xdp = _round_up(x_dim, lane)       # padded output features (lane-dense out)

    tb = min(block_b, _round_up(B, sub))   # batch tile
    bp = _round_up(B, tb)                  # padded batch

    cdt = compute_dtype
    cond_p = jnp.zeros((bp, cdp), cdt).at[:B, :cond_dim].set(cond.astype(cdt))
    wv_p = jnp.zeros((cdp, idp), cdt).at[:cond_dim, :inner_dim].set(wv.astype(cdt))
    wo_p = jnp.zeros((idp, xdp), cdt).at[:inner_dim, :x_dim].set(wo.astype(cdt))
    bo_p = jnp.zeros((1, xdp), jnp.float32).at[:, :x_dim].set(
        jnp.asarray(bo, jnp.float32).reshape(1, x_dim))

    out = pl.pallas_call(
        _cross_attention_kernel,
        out_shape=jax.ShapeDtypeStruct((bp, xdp), jnp.float32),
        grid_spec=pltpu.PrefetchScalarGridSpec(
            num_scalar_prefetch=0,
            grid=(bp // tb,),
            in_specs=[
                pl.BlockSpec((tb, cdp), lambda i: (i, 0)),   # cond: batch-tiled
                pl.BlockSpec((cdp, idp), lambda i: (0, 0)),  # Wv: VMEM-resident
                pl.BlockSpec((idp, xdp), lambda i: (0, 0)),  # Wo: VMEM-resident
                pl.BlockSpec((1, xdp), lambda i: (0, 0)),    # bias: resident
            ],
            out_specs=pl.BlockSpec((tb, xdp), lambda i: (i, 0)),
        ),
        compiler_params=pltpu.CompilerParams(
            dimension_semantics=("parallel",)),  # megacore / v7x 2-TC sharding
    )(cond_p, wv_p, wo_p, bo_p)

    return out[:B, :x_dim]


def reference(x, cond, wq, wk, wv, wo, bo, *, num_heads, dim_head):
    """Pure-JAX transcription of the full PyTorch forward (q/k/softmax kept)."""
    B = x.shape[0]
    scale = dim_head ** (-0.5)
    q = (x @ wq).reshape(B, num_heads, dim_head, 1) * scale
    k = (cond @ wk).reshape(B, num_heads, dim_head, 1)
    v = (cond @ wv).reshape(B, num_heads, dim_head, 1)
    sim = jnp.einsum('bhdi,bhdj->bhij', q, k)
    attn = jax.nn.softmax(sim, axis=-1)
    out = jnp.einsum('bhij,bhdj->bhid', attn, v)        # (B, H, 1, dh)
    out = out.reshape(B, num_heads * dim_head)           # 'b h c n -> b (h c n)'
    return out @ wo + bo


if __name__ == "__main__":
    B = 2
    x_dim = 32
    cond_dim = 16
    num_heads = 4
    dim_head = 8
    inner_dim = num_heads * dim_head

    key = jax.random.PRNGKey(0)
    kx, kc, k1, k2, k3, k4, k5 = jax.random.split(key, 7)

    x = jax.random.normal(kx, (B, x_dim), dtype=jnp.float32)
    cond = jax.random.normal(kc, (B, cond_dim), dtype=jnp.float32)

    # Deterministic synthetic parameters, stored as (in_features, out_features).
    wq = jax.random.normal(k1, (x_dim, inner_dim), dtype=jnp.float32) * 0.05
    wk = jax.random.normal(k2, (cond_dim, inner_dim), dtype=jnp.float32) * 0.05
    wv = jax.random.normal(k3, (cond_dim, inner_dim), dtype=jnp.float32) * 0.05
    wo = jax.random.normal(k4, (inner_dim, x_dim), dtype=jnp.float32) * 0.05
    bo = jax.random.normal(k5, (x_dim,), dtype=jnp.float32) * 0.05

    y_ref = reference(x, cond, wq, wk, wv, wo, bo,
                      num_heads=num_heads, dim_head=dim_head)

    # Exact-semantics check: f32 compute path must match the full reference.
    y_f32 = cross_attention(x, cond, wq, wk, wv, wo, bo,
                            num_heads=num_heads, dim_head=dim_head,
                            compute_dtype=jnp.float32)
    y_f32 = jax.block_until_ready(y_f32)
    assert y_f32.shape == (B, x_dim)
    assert jnp.allclose(y_f32, y_ref, atol=2e-3, rtol=2e-3), "f32 mismatch"

    # Default perf config: bf16 inputs (f32 accumulation), looser tolerance.
    y_bf16 = cross_attention(x, cond, wq, wk, wv, wo, bo,
                             num_heads=num_heads, dim_head=dim_head)
    y_bf16 = jax.block_until_ready(y_bf16)
    assert y_bf16.shape == (B, x_dim)
    assert jnp.allclose(y_bf16, y_ref, atol=3e-2, rtol=3e-2), "bf16 mismatch"

    print("KERNEL_OK")
</pallas_src>

<mosaic_0001>
module attributes {stable_mosaic.version = 11 : i64} {
  func.func @_cross_attention_kernel(%arg0: i32, %arg1: memref<16x128xf32, #tpu.memory_space<vmem>>, %arg2: memref<128x128xf32, #tpu.memory_space<vmem>>, %arg3: memref<128x128xf32, #tpu.memory_space<vmem>>, %arg4: memref<1x128xf32, #tpu.memory_space<vmem>>, %arg5: memref<16x128xf32, #tpu.memory_space<vmem>>) attributes {dimension_semantics = [#tpu.dimension_semantics<parallel>], iteration_bounds = array<i64: 1>, scalar_prefetch = 0 : i64, scratch_operands = 0 : i64, tpu.core_type = #tpu.core_type<tc>, window_params = [{transform_indices = @transform_0, window_bounds = array<i64: 16, 128>}, {pipeline_mode = #tpu.pipeline_mode<synchronous>, transform_indices = @transform_1, window_bounds = array<i64: 128, 128>}, {pipeline_mode = #tpu.pipeline_mode<synchronous>, transform_indices = @transform_2, window_bounds = array<i64: 128, 128>}, {pipeline_mode = #tpu.pipeline_mode<synchronous>, transform_indices = @transform_3, window_bounds = array<i64: 1, 128>}, {transform_indices = @transform_4, window_bounds = array<i64: 16, 128>}]} {
    %c0 = arith.constant 0 : index
    %c0_0 = arith.constant 0 : index
    %0 = vector.load %arg1[%c0, %c0_0] : memref<16x128xf32, #tpu.memory_space<vmem>>, vector<16x128xf32>
    %c0_1 = arith.constant 0 : index
    %c0_2 = arith.constant 0 : index
    %1 = vector.load %arg2[%c0_1, %c0_2] : memref<128x128xf32, #tpu.memory_space<vmem>>, vector<128x128xf32>
    %cst = arith.constant dense<0.000000e+00> : vector<16x128xf32>
    %2 = tpu.matmul %0, %1, %cst {dimension_numbers = #tpu.dot_dimension_numbers<[1], [0], [0], [1], [0, 0, 1, 1], [], []>} : vector<16x128xf32>, vector<128x128xf32>, vector<16x128xf32> -> vector<16x128xf32>
    %c0_3 = arith.constant 0 : index
    %c0_4 = arith.constant 0 : index
    %3 = vector.load %arg3[%c0_3, %c0_4] : memref<128x128xf32, #tpu.memory_space<vmem>>, vector<128x128xf32>
    %cst_5 = arith.constant dense<0.000000e+00> : vector<16x128xf32>
    %4 = tpu.matmul %2, %3, %cst_5 {dimension_numbers = #tpu.dot_dimension_numbers<[1], [0], [0], [1], [0, 0, 1, 1], [], []>} : vector<16x128xf32>, vector<128x128xf32>, vector<16x128xf32> -> vector<16x128xf32>
    %c0_6 = arith.constant 0 : index
    %c0_7 = arith.constant 0 : index
    %5 = vector.load %arg4[%c0_6, %c0_7] : memref<1x128xf32, #tpu.memory_space<vmem>>, vector<1x128xf32>
    %6 = vector.broadcast %5 : vector<1x128xf32> to vector<16x128xf32>
    %7 = arith.addf %4, %6 : vector<16x128xf32>
    %c0_8 = arith.constant 0 : index
    %c0_9 = arith.constant 0 : index
    %8 = vector.load %arg5[%c0_8, %c0_9] : memref<16x128xf32, #tpu.memory_space<vmem>>, vector<16x128xf32>
    tpu.vector_store %arg5[%c0_8, %c0_9], %7 {strides = array<i32>} : memref<16x128xf32, #tpu.memory_space<vmem>>, vector<16x128xf32>,
    return
  }
  func.func @transform_0(%arg0: i32) -> (i32, i32) {
    %c0_i32 = arith.constant 0 : i32
    %c0_i32_0 = arith.constant 0 : i32
    return %arg0, %c0_i32 : i32, i32
  }
  func.func @transform_1(%arg0: i32) -> (i32, i32) {
    %c0_i32 = arith.constant 0 : i32
    %c0_i32_0 = arith.constant 0 : i32
    %c0_i32_1 = arith.constant 0 : i32
    return %c0_i32, %c0_i32_0 : i32, i32
  }
  func.func @transform_2(%arg0: i32) -> (i32, i32) {
    %c0_i32 = arith.constant 0 : i32
    %c0_i32_0 = arith.constant 0 : i32
    %c0_i32_1 = arith.constant 0 : i32
    return %c0_i32, %c0_i32_0 : i32, i32
  }
  func.func @transform_3(%arg0: i32) -> (i32, i32) {
    %c0_i32 = arith.constant 0 : i32
    %c0_i32_0 = arith.constant 0 : i32
    %c0_i32_1 = arith.constant 0 : i32
    return %c0_i32, %c0_i32_0 : i32, i32
  }
  func.func @transform_4(%arg0: i32) -> (i32, i32) {
    %c0_i32 = arith.constant 0 : i32
    %c0_i32_0 = arith.constant 0 : i32
    return %arg0, %c0_i32 : i32, i32
  }
}

</mosaic_0001>

<bundles_post_ra>
// kernel: tpu_custom_call.1
= control target key start
LH: loop header
LB: loop body
LE: loop exit
PB: predicated region body
PF: predicated region fallthrough
CT: control target
= control target key end

     0   :  { %9 = vsyncpa [#allocation3], 0  ;;  %s642_s0 = inlined_call_operand.hbm [shape: f32[16,128], index: 0, kind: input, shape index: {}]   ;;  %s643_s1 = inlined_call_operand.hbm [shape: f32[128,128], index: 1, kind: input, shape index: {}]   ;;  %s644_s2 = inlined_call_operand.hbm [shape: f32[128,128], index: 2, kind: input, shape index: {}]   ;;  %s645_s3 = inlined_call_operand.vmem [shape: f32[1,128], index: 3, kind: input, shape index: {}]   ;;  %s646_s4 = inlined_call_operand.hbm [shape: f32[16,128], index: 4, kind: output, shape index: {}]  }
   0x1   :  { %10 = vsyncpa [#allocation6], 0 }
   0x2   :  { %11 = vsyncpa [#allocation4], 0  ;;  %s541_s15 = smov [#allocation5]   ;;  %s542_s17 = smov [#allocation2]  }
   0x3   :  { %s29_s16 = sshll.u32 %s541_s15, 4  ;;  %s17_s18 = sshll.u32 %s542_s17, 4  ;;  %s30_s16 = int_to_ptr.vmem [resolvable:$true] %s29_s16  ;;  %s572_s18 = int_to_ptr.vmem [resolvable:$true] %s17_s18 }
   0x4   :  { %s447_s21 = scalar_lea.hbm %s643_s1, 2048 }
   0x5   :  { %p448_p0 = scmp.ne.s32.totalorder %s643_s1, %s447_s21  ;;  %p451_p1 = scmp.lt.u32.totalorder %s447_s21, %s643_s1 }
   0x7   :  { %p453_p2 = pnand %p451_p1, %p448_p0 }
   0x9   :  { %456 = shalt.err (!%p453_p2)
}
   0xa   :  { %s457_s26 = scalar_lea.vmem %s30_s16, 2048  ;;  %p462_p4 = scmp.lt.s32.totalorder %s30_s16, %s30_s16 }
   0xb   :  { %p458_p3 = scmp.ne.s32.totalorder %s30_s16, %s457_s26  ;;  %p463_p5 = scmp.lt.s32.totalorder %s457_s26, %s457_s26 }
   0xd   :  { %p464_p6 = por %p463_p5, %p462_p4 }
   0xf   :  { %p465_p7 = pnand %p464_p6, %p458_p3 }
  0x11   :  { %468 = shalt.err (!%p465_p7)
}
  0x12   :  { %s543_s27 = smov 128   ;;  %s544_s28 = smov 8  }
  0x13   :  { %35 = dma.hbm_to_vmem [thread:$0]  %s643_s1, 2048, %s30_s16, [#allocation6], %s543_s27, %s543_s27, %s544_s28  }
  0x14   :  { %s469_s7 = scalar_lea.hbm %s642_s0, 256 }
  0x15   :  { %p470_p8 = scmp.ne.s32.totalorder %s642_s0, %s469_s7  ;;  %p473_p9 = scmp.lt.u32.totalorder %s469_s7, %s642_s0 }
  0x17   :  { %p475_p10 = pnand %p473_p9, %p470_p8 }
  0x19   :  { %478 = shalt.err (!%p475_p10)
}
  0x1a   :  { %s479_s12 = scalar_lea.vmem %s572_s18, 256  ;;  %p484_p12 = scmp.lt.s32.totalorder %s572_s18, %s572_s18 }
  0x1b   :  { %p480_p11 = scmp.ne.s32.totalorder %s572_s18, %s479_s12  ;;  %p485_p13 = scmp.lt.s32.totalorder %s479_s12, %s479_s12 }
  0x1d   :  { %p486_p0 = por %p485_p13, %p484_p12 }
  0x1f   :  { %p487_p1 = pnand %p486_p0, %p480_p11 }
  0x21   :  { %490 = shalt.err (!%p487_p1)
}
  0x22   :  { %23 = dma.hbm_to_vmem [thread:$0]  %s642_s0, 256, %s572_s18, [#allocation3], %s543_s27, %s543_s27, %s544_s28  }
  0x23   :  { %s545_s14 = smov [#allocation7]   ;;  %s491_s19 = scalar_lea.hbm %s644_s2, 2048 }
  0x24   :  { %s41_s15 = sshll.u32 %s545_s14, 4  ;;  %p492_p2 = scmp.ne.s32.totalorder %s644_s2, %s491_s19  ;;  %s42_s15 = int_to_ptr.vmem [resolvable:$true] %s41_s15 }
  0x25   :  { %p495_p3 = scmp.lt.u32.totalorder %s491_s19, %s644_s2 }
  0x27   :  { %p497_p4 = pnand %p495_p3, %p492_p2 }
  0x29   :  { %500 = shalt.err (!%p497_p4)
}
  0x2a   :  { %s501_s24 = scalar_lea.vmem %s42_s15, 2048  ;;  %p506_p6 = scmp.lt.s32.totalorder %s42_s15, %s42_s15 }
  0x2b   :  { %p502_p5 = scmp.ne.s32.totalorder %s42_s15, %s501_s24  ;;  %p507_p7 = scmp.lt.s32.totalorder %s501_s24, %s501_s24 }
  0x2d   :  { %p508_p8 = por %p507_p7, %p506_p6 }
  0x2f   :  { %p509_p9 = pnand %p508_p8, %p502_p5 }
  0x31   :  { %512 = shalt.err (!%p509_p9)
}
  0x32   :  { %47 = dma.hbm_to_vmem [thread:$0]  %s644_s2, 2048, %s42_s15, [#allocation6], %s543_s27, %s543_s27, %s544_s28  }
  0x33   :  { %535 = dma.done.wait [#allocation3], 256  }
  0x34   :  { %536 = vsyncadd [#allocation3], 4294967040 }
  0x35   :  { %537 = dma.done.wait [#allocation6], 4096  }
  0x36   :  { %538 = vsyncadd [#allocation6], 4294963200  ;;  %v61_v0 = vld [vmem:[#allocation5] sm:$0xff]  ;;  %v62_v1 = vld [vmem:[#allocation5 + $0x8] sm:$0xff]  ;;  %s546_s26 = smov [#allocation8]  }
  0x37   :  { %v63_v2 = vld [vmem:[#allocation5 + $0x10] sm:$0xff]  ;;  %v377_v3 = vpack.c.bf16 %v62_v1, %v61_v0  ;;  %v64_v4 = vld [vmem:[#allocation5 + $0x18] sm:$0xff]  ;;  %v65_v6 = vld [vmem:[#allocation5 + $0x20] sm:$0xff]  ;;  %s257_s29 = sshll.u32 %s546_s26, 4  ;;  %s258_s29 = int_to_ptr.vmem [resolvable:$true] %s257_s29 }
  0x38   :  { %v381_v5 = vpack.c.bf16 %v64_v4, %v63_v2  ;;  %v66_v7 = vld [vmem:[#allocation5 + $0x28] sm:$0xff]  ;;  %v67_v9 = vld [vmem:[#allocation5 + $0x30] sm:$0xff]  ;;  %v68_v10 = vld [vmem:[#allocation5 + $0x38] sm:$0xff]  ;;  %s513_s30 = scalar_lea.vmem %s258_s29, 256  ;;  %p518_p11 = scmp.lt.s32.totalorder %s258_s29, %s258_s29 }
  0x39   :  { %378 = vmatprep.subr.bf16.mxu0 %v377_v3  ;;  %v385_v8 = vpack.c.bf16 %v66_v7, %v65_v6  ;;  %v59_v11 = vld [vmem:[#allocation2] sm:$0xff]  ;;  %v152_v12 = vld [vmem:[#allocation7] sm:$0xff]  ;;  %v153_v13 = vld [vmem:[#allocation7 + $0x8] sm:$0xff]  ;;  %v389_v20 = vpack.c.bf16 %v68_v10, %v67_v9  ;;  %p514_p10 = scmp.ne.s32.totalorder %s258_s29, %s513_s30  ;;  %p519_p12 = scmp.lt.s32.totalorder %s513_s30, %s513_s30 }
  0x3a   :  { %380 = vmatpush3.bf16.msra.mxu0 %v377_v3  ;;  %339 = vmatprep.mubr.f32.mxu0 %v59_v11  ;;  %v154_v14 = vld [vmem:[#allocation7 + $0x10] sm:$0xff]  ;;  %v409_v15 = vpack.c.bf16 %v153_v13, %v152_v12  ;;  %v155_v16 = vld [vmem:[#allocation7 + $0x18] sm:$0xff]  ;;  %v156_v18 = vld [vmem:[#allocation7 + $0x20] sm:$0xff] }
  0x3b   :  { %382 = vmatprep.subr.bf16.mxu0 %v381_v5  ;;  %v413_v17 = vpack.c.bf16 %v155_v16, %v154_v14  ;;  %v157_v19 = vld [vmem:[#allocation7 + $0x28] sm:$0xff]  ;;  %v69_v21 = vld [vmem:[#allocation5 + $0x40] sm:$0xff]  ;;  %v158_v24 = vld [vmem:[#allocation7 + $0x30] sm:$0xff]  ;;  %p520_p13 = por %p519_p12, %p518_p11 }
  0x3c   :  { %410 = vmatprep.subr.bf16.mxu1 %v409_v15  ;;  %v70_v22 = vld [vmem:[#allocation5 + $0x48] sm:$0xff]  ;;  %v417_v23 = vpack.c.bf16 %v157_v19, %v156_v18  ;;  %v159_v25 = vld [vmem:[#allocation7 + $0x38] sm:$0xff]  ;;  %v71_v27 = vld [vmem:[#allocation5 + $0x50] sm:$0xff] }
  0x3d   :  { %412 = vmatpush3.bf16.msra.mxu1 %v409_v15  ;;  %v393_v26 = vpack.c.bf16 %v70_v22, %v69_v21  ;;  %v72_v28 = vld [vmem:[#allocation5 + $0x58] sm:$0xff]  ;;  %v421_v29 = vpack.c.bf16 %v159_v25, %v158_v24  ;;  %v160_v30 = vld [vmem:[#allocation7 + $0x40] sm:$0xff]  ;;  %v161_v31 = vld [vmem:[#allocation7 + $0x48] sm:$0xff]  ;;  %p521_p0 = pnand %p520_p13, %p514_p10 }
  0x3e   :  { %384 = vmatpush3.bf16.msra.mxu0 %v381_v5  ;;  %414 = vmatprep.subr.bf16.mxu1 %v413_v17  ;;  %v397_v32 = vpack.c.bf16 %v72_v28, %v71_v27  ;;  %v73_v33 = vld [vmem:[#allocation5 + $0x60] sm:$0xff]  ;;  %v74_v34 = vld [vmem:[#allocation5 + $0x68] sm:$0xff]  ;;  %v425_v35 = vpack.c.bf16 %v161_v31, %v160_v30  ;;  %v162_v36 = vld [vmem:[#allocation7 + $0x50] sm:$0xff] }
  0x3f   :  { %386 = vmatprep.subr.bf16.mxu0 %v385_v8  ;;  %v163_v37 = vld [vmem:[#allocation7 + $0x58] sm:$0xff]  ;;  %v401_v38 = vpack.c.bf16 %v74_v34, %v73_v33  ;;  %v75_v39 = vld [vmem:[#allocation5 + $0x70] sm:$0xff]  ;;  %v164_v42 = vld [vmem:[#allocation7 + $0x60] sm:$0xff] }
  0x40   :  { %v76_v40 = vld [vmem:[#allocation5 + $0x78] sm:$0xff]  ;;  %v429_v41 = vpack.c.bf16 %v163_v37, %v162_v36  ;;  %v165_v43 = vld [vmem:[#allocation7 + $0x68] sm:$0xff]  ;;  %v166_v46 = vld [vmem:[#allocation7 + $0x70] sm:$0xff] }
  0x41   :  { %416 = vmatpush3.bf16.msra.mxu1 %v413_v17  ;;  %v405_v44 = vpack.c.bf16 %v76_v40, %v75_v39  ;;  %v433_v45 = vpack.c.bf16 %v165_v43, %v164_v42  ;;  %v167_v47 = vld [vmem:[#allocation7 + $0x78] sm:$0xff]  ;;  %v270_v52 = vld [vmem:[%s645_s3] ss:$0 sm:$0xff] }
  0x42   :  { %388 = vmatpush3.bf16.msra.mxu0 %v385_v8  ;;  %418 = vmatprep.subr.bf16.mxu1 %v417_v23  ;;  %v437_v48 = vpack.c.bf16 %v167_v47, %v166_v46  ;;  %v60_v49 = vld [vmem:[#allocation2 + $0x8] sm:$0xff] }
  0x43   :  { %390 = vmatprep.subr.bf16.mxu0 %v389_v20 }
  0x45   :  { %420 = vmatpush3.bf16.msra.mxu1 %v417_v23 }
  0x46   :  { %392 = vmatpush3.bf16.msra.mxu0 %v389_v20  ;;  %422 = vmatprep.subr.bf16.mxu1 %v421_v29 }
  0x47   :  { %394 = vmatprep.subr.bf16.mxu0 %v393_v26 }
  0x49   :  { %424 = vmatpush3.bf16.msra.mxu1 %v421_v29 }
  0x4a   :  { %396 = vmatpush3.bf16.msra.mxu0 %v393_v26  ;;  %426 = vmatprep.subr.bf16.mxu1 %v425_v35 }
  0x4b   :  { %398 = vmatprep.subr.bf16.mxu0 %v397_v32 }
  0x4d   :  { %428 = vmatpush3.bf16.msra.mxu1 %v425_v35 }
  0x4e   :  { %400 = vmatpush3.bf16.msra.mxu0 %v397_v32  ;;  %430 = vmatprep.subr.bf16.mxu1 %v429_v41 }
  0x4f   :  { %402 = vmatprep.subr.bf16.mxu0 %v401_v38 }
  0x51   :  { %432 = vmatpush3.bf16.msra.mxu1 %v429_v41 }
  0x52   :  { %404 = vmatpush3.bf16.msra.mxu0 %v401_v38  ;;  %434 = vmatprep.subr.bf16.mxu1 %v433_v45 }
  0x53   :  { %406 = vmatprep.subr.bf16.mxu0 %v405_v44 }
  0x55   :  { %436 = vmatpush3.bf16.msra.mxu1 %v433_v45 }
  0x56   :  { %408 = vmatpush3.bf16.msra.mxu0 %v405_v44  ;;  %438 = vmatprep.subr.bf16.mxu1 %v437_v48 }
  0x59   :  { %340 = vmatmul.mubr.f32.vlgmr.msra.gmra.mrb[0].mxu0 %v60_v49  ;;  %440 = vmatpush3.bf16.msra.mxu1 %v437_v48 }
 0x12c   :  { %v341_v50 = vpop.f32.mrb[0].mxu0 }
 0x12d   :  { %v143_v51 = vpop.f32.mrb[1].mxu0 }
 0x12e   :  { %374 = vmatprep.mubr.f32.mxu1 %v143_v51 }
 0x12f   :  { %375 = vmatmul.mubr.f32.vlgmr.msra.gmra.mrb[0].mxu1 %v341_v50 }
 0x202   :  { %v376_v53 = vpop.f32.mrb[0].mxu1 }
 0x203   :  { %v247_v54 = vadd.f32 %v376_v53, %v270_v52  ;;  %v241_v55 = vpop.f32.mrb[1].mxu1 }
 0x204   :  { %v242_v56 = vadd.f32 %v270_v52, %v241_v55 }
 0x205   :  { %251 = vst [vmem:[#allocation8 + $0x8] sm:$0xff] %v247_v54 }
 0x206   :  { %250 = vst [vmem:[#allocation8] sm:$0xff] %v242_v56 }
 0x207   :  { %524 = shalt.err (!%p521_p0)
}
 0x208   :  { %s525_s3 = scalar_lea.hbm %s646_s4, 256 }
 0x209   :  { %p526_p1 = scmp.ne.s32.totalorder %s646_s4, %s525_s3  ;;  %p529_p2 = scmp.lt.u32.totalorder %s525_s3, %s646_s4 }
 0x20b   :  { %p531_p3 = pnand %p529_p2, %p526_p1 }
 0x20d   :  { %534 = shalt.err (!%p531_p3)
}
 0x20e   :  { %263 = dma.vmem_to_hbm [thread:$0]  %s258_s29, 256, %s646_s4, [#allocation4], %s543_s27, %s543_s27, %s544_s28  }
 0x20f   :  { %539 = dma.done.wait [#allocation4], 256  }
 0x210   :  { %540 = vsyncadd [#allocation4], 4294967040 }
 0x211   :  { %267 = vsyncpa [#allocation3], 1 }
 0x212   :  { %268 = vsyncpa [#allocation6], 1 }
 0x213   :  { %269 = vsyncpa [#allocation4], 1 }

</bundles_post_ra>
